<compile_context>
chip_gen: v7x
topology: tpu7x:2x2x1
jax: 0.10.0
libtpu: 0.0.40
codegen_flags: <defaults>
</compile_context>

<pallas_src>
import jax
import jax.numpy as jnp
from jax import lax
from jax.experimental import pallas as pl
from jax.experimental.pallas import tpu as pltpu

NUM_FEATURES = 96
NUM_CLASSES = 16
H0 = 512
H1 = 128
BN_EPS = 1e-5
LEAKY_SLOPE = 0.05

MAX_TILE = 2048                    # batch-tile rows (also fused-path threshold)
VMEM_LIMIT = 32 * 1024 * 1024      # explicit scoped-VMEM budget (safe on v5e/v6e/v7x)


def _leaky_relu(x):
    # max(x, 0.05*x) == leaky_relu(x, 0.05) for slope in [0,1]; one VALU op fewer.
    return jnp.maximum(x, LEAKY_SLOPE * x)


def _round_up(n, m):
    return (n + m - 1) // m * m


def _cdiv(a, b):
    return -(-a // b)


# ---------------------------------------------------------------------------
# Fused single-tile kernel: fc0 + leaky + batch stats + BN + fc1 + leaky + fc2
# ---------------------------------------------------------------------------
def _make_fused_kernel(tile_b, batch):
    need_mask = tile_b != batch
    inv_b = 1.0 / batch

    def fused_kernel(x_ref, w0_ref, b0_ref, gamma_ref, beta_ref,
                     w1_ref, b1_ref, w2_ref, b2_ref, out_ref):
        h0 = jnp.dot(x_ref[...], w0_ref[...], preferred_element_type=jnp.float32)
        h0 = _leaky_relu(h0 + b0_ref[...])
        if need_mask:  # exclude padded rows from the batch statistics
            row = lax.broadcasted_iota(jnp.int32, (tile_b, 1), 0)
            hm = jnp.where(row < batch, h0, 0.0)
        else:
            hm = h0
        mean = jnp.sum(hm, axis=0, keepdims=True) * inv_b
        var = jnp.maximum(
            jnp.sum(hm * hm, axis=0, keepdims=True) * inv_b - mean * mean, 0.0)
        scale = gamma_ref[...] * lax.rsqrt(var + BN_EPS)
        shift = beta_ref[...] - mean * scale
        h = h0 * scale + shift
        h = _leaky_relu(jnp.dot(h.astype(jnp.bfloat16), w1_ref[...],
                                preferred_element_type=jnp.float32) + b1_ref[...])
        out = jnp.dot(h.astype(jnp.bfloat16), w2_ref[...],
                      preferred_element_type=jnp.float32) + b2_ref[...]
        out_ref[...] = out.astype(out_ref.dtype)

    return fused_kernel


# ---------------------------------------------------------------------------
# Pass 1 (large batch): per-tile partial sum / sum-of-squares of leaky(fc0(x))
# ---------------------------------------------------------------------------
def _make_stats_kernel(tile_b, batch, padded_batch):
    need_mask = padded_batch != batch

    def stats_kernel(x_ref, w0_ref, b0_ref, sum_ref, sumsq_ref):
        h = jnp.dot(x_ref[...], w0_ref[...], preferred_element_type=jnp.float32)
        h = _leaky_relu(h + b0_ref[...])
        if need_mask:  # zero padded rows so they don't pollute the stats
            row = (pl.program_id(0) * tile_b
                   + lax.broadcasted_iota(jnp.int32, (tile_b, 1), 0))
            h = jnp.where(row < batch, h, 0.0)
        sum_ref[...] = jnp.sum(h, axis=0, keepdims=True)
        sumsq_ref[...] = jnp.sum(h * h, axis=0, keepdims=True)

    return stats_kernel


# ---------------------------------------------------------------------------
# Pass 2 (large batch): full forward; BN affine already folded into (w1, b1)
# ---------------------------------------------------------------------------
def _fwd_kernel(x_ref, w0_ref, b0_ref, w1_ref, b1_ref, w2_ref, b2_ref, out_ref):
    h = jnp.dot(x_ref[...], w0_ref[...], preferred_element_type=jnp.float32)
    h = _leaky_relu(h + b0_ref[...])
    h = _leaky_relu(jnp.dot(h.astype(jnp.bfloat16), w1_ref[...],
                            preferred_element_type=jnp.float32) + b1_ref[...])
    out = jnp.dot(h.astype(jnp.bfloat16), w2_ref[...],
                  preferred_element_type=jnp.float32) + b2_ref[...]
    out_ref[...] = out.astype(out_ref.dtype)


# ---------------------------------------------------------------------------
# Wrapper
# ---------------------------------------------------------------------------
@jax.jit
def net_forward(x, kp):
    """x: (B, NUM_FEATURES) f32.  kp: bf16/f32 kernel params (see prepare)."""
    batch = x.shape[0]
    x_bf = x.astype(jnp.bfloat16)  # single cast; kernels stream unpadded (B,96) bf16

    w0_spec = pl.BlockSpec((NUM_FEATURES, H0), lambda i: (0, 0))
    b0_spec = pl.BlockSpec((1, H0), lambda i: (0, 0))

    if batch <= MAX_TILE:
        # ---------------- fused single-tile fast path ----------------
        tile_b = _round_up(batch, 8)
        if tile_b != batch:
            x_bf = jnp.pad(x_bf, ((0, tile_b - batch), (0, 0)))
        out = pl.pallas_call(
            _make_fused_kernel(tile_b, batch),
            out_shape=jax.ShapeDtypeStruct((tile_b, NUM_CLASSES), jnp.float32),
            grid=(1,),
            in_specs=[
                pl.BlockSpec((tile_b, NUM_FEATURES), lambda i: (0, 0)),
                w0_spec,
                b0_spec,
                pl.BlockSpec((1, H0), lambda i: (0, 0)),            # gamma
                pl.BlockSpec((1, H0), lambda i: (0, 0)),            # beta
                pl.BlockSpec((H0, H1), lambda i: (0, 0)),           # w1
                pl.BlockSpec((1, H1), lambda i: (0, 0)),            # b1
                pl.BlockSpec((H1, NUM_CLASSES), lambda i: (0, 0)),  # w2
                pl.BlockSpec((1, NUM_CLASSES), lambda i: (0, 0)),   # b2
            ],
            out_specs=pl.BlockSpec((tile_b, NUM_CLASSES), lambda i: (0, 0)),
            compiler_params=pltpu.CompilerParams(
                dimension_semantics=("arbitrary",),
                vmem_limit_bytes=VMEM_LIMIT),
        )(x_bf, kp["w0_t"], kp["b0"], kp["gamma"], kp["beta"],
          kp["w1_t"], kp["b1"], kp["w2_t"], kp["b2"])
        return out[:batch] if tile_b != batch else out

    # ---------------- streamed two-pass path (batch > MAX_TILE) ----------------
    grid_n = _cdiv(batch, MAX_TILE)
    tile_b = _round_up(_cdiv(batch, grid_n), 16)   # minimize padding, bf16-friendly
    padded_batch = tile_b * grid_n
    if padded_batch != batch:
        x_bf = jnp.pad(x_bf, ((0, padded_batch - batch), (0, 0)))

    x_spec = pl.BlockSpec((tile_b, NUM_FEATURES), lambda i: (i, 0))

    # pass 1: per-tile partial stats (grid axis "parallel" -> both TCs on v7x)
    part_sum, part_sumsq = pl.pallas_call(
        _make_stats_kernel(tile_b, batch, padded_batch),
        out_shape=(jax.ShapeDtypeStruct((grid_n, H0), jnp.float32),
                   jax.ShapeDtypeStruct((grid_n, H0), jnp.float32)),
        grid=(grid_n,),
        in_specs=[x_spec, w0_spec, b0_spec],
        out_specs=(pl.BlockSpec((1, H0), lambda i: (i, 0)),
                   pl.BlockSpec((1, H0), lambda i: (i, 0))),
        compiler_params=pltpu.CompilerParams(
            dimension_semantics=("parallel",),
            vmem_limit_bytes=VMEM_LIMIT),
    )(x_bf, kp["w0_t"], kp["b0"])

    # tiny XLA glue: combine partials, fold BN affine into fc1
    sums = jnp.sum(part_sum, axis=0, keepdims=True)
    sumsqs = jnp.sum(part_sumsq, axis=0, keepdims=True)
    mean = sums / batch
    var = jnp.maximum(sumsqs / batch - mean * mean, 0.0)     # biased (training mode)
    scale = kp["gamma"] * lax.rsqrt(var + BN_EPS)            # (1, H0)
    shift = kp["beta"] - mean * scale                        # (1, H0)
    w1_f32 = kp["w1_t"].astype(jnp.float32)
    w1_fold = (scale.reshape(H0, 1) * w1_f32).astype(jnp.bfloat16)
    b1_fold = jnp.dot(shift, w1_f32) + kp["b1"]              # (1, H1) f32

    # pass 2: full forward, batch tiles independent
    out = pl.pallas_call(
        _fwd_kernel,
        out_shape=jax.ShapeDtypeStruct((padded_batch, NUM_CLASSES), jnp.float32),
        grid=(grid_n,),
        in_specs=[
            x_spec,
            w0_spec,
            b0_spec,
            pl.BlockSpec((H0, H1), lambda i: (0, 0)),           # w1 (BN folded)
            pl.BlockSpec((1, H1), lambda i: (0, 0)),            # b1 (BN folded)
            pl.BlockSpec((H1, NUM_CLASSES), lambda i: (0, 0)),  # w2
            pl.BlockSpec((1, NUM_CLASSES), lambda i: (0, 0)),   # b2
        ],
        out_specs=pl.BlockSpec((tile_b, NUM_CLASSES), lambda i: (i, 0)),
        compiler_params=pltpu.CompilerParams(
            dimension_semantics=("parallel",),
            vmem_limit_bytes=VMEM_LIMIT),
    )(x_bf, kp["w0_t"], kp["b0"], w1_fold, b1_fold, kp["w2_t"], kp["b2"])

    return out[:batch] if padded_batch != batch else out


# ---------------------------------------------------------------------------
# Params
# ---------------------------------------------------------------------------
def init_params(key):
    """Deterministic init mimicking PyTorch Linear default U(-1/sqrt(fan_in), +)."""
    ks = jax.random.split(key, 6)

    def linear(kw, kb, fan_in, fan_out):
        bound = float(fan_in) ** -0.5
        w = jax.random.uniform(kw, (fan_out, fan_in), jnp.float32, -bound, bound)
        b = jax.random.uniform(kb, (1, fan_out), jnp.float32, -bound, bound)
        return w.T, b  # pre-transpose to (in, out)

    w0_t, b0 = linear(ks[0], ks[1], NUM_FEATURES, H0)
    w1_t, b1 = linear(ks[2], ks[3], H0, H1)
    w2_t, b2 = linear(ks[4], ks[5], H1, NUM_CLASSES)
    return {
        "w0_t": w0_t, "b0": b0,
        "w1_t": w1_t, "b1": b1,
        "w2_t": w2_t, "b2": b2,
        "gamma": jnp.ones((1, H0), jnp.float32),   # BatchNorm1d weight
        "beta": jnp.zeros((1, H0), jnp.float32),   # BatchNorm1d bias
    }


def prepare_kernel_params(p):
    """Cast matmul weights to bf16 (biases / BN params stay f32); no padding."""
    return {
        "w0_t": p["w0_t"].astype(jnp.bfloat16), "b0": p["b0"],
        "w1_t": p["w1_t"].astype(jnp.bfloat16), "b1": p["b1"],
        "w2_t": p["w2_t"].astype(jnp.bfloat16), "b2": p["b2"],
        "gamma": p["gamma"], "beta": p["beta"],
    }


# ---------------------------------------------------------------------------
# Pure-JAX reference (mirrors the kernel's bf16 matmul operands, f32 accumulate)
# ---------------------------------------------------------------------------
def net_reference(x, p):
    def mm(a, w):
        return jnp.dot(a.astype(jnp.bfloat16), w.astype(jnp.bfloat16),
                       preferred_element_type=jnp.float32)

    h = _leaky_relu(mm(x, p["w0_t"]) + p["b0"])
    mean = jnp.mean(h, axis=0, keepdims=True)
    var = jnp.mean((h - mean) ** 2, axis=0, keepdims=True)   # biased (training mode)
    h = (h - mean) * lax.rsqrt(var + BN_EPS) * p["gamma"] + p["beta"]
    h = _leaky_relu(mm(h, p["w1_t"]) + p["b1"])
    return mm(h, p["w2_t"]) + p["b2"]


if __name__ == "__main__":
    key = jax.random.PRNGKey(0)
    k_x, k_p, k_x2 = jax.random.split(key, 3)

    params = init_params(k_p)
    kparams = prepare_kernel_params(params)

    # Small batch (>=2 required for training-mode BN) -> fused single-tile path.
    B = 8
    x = jax.random.normal(k_x, (B, NUM_FEATURES), jnp.float32)
    out = jax.block_until_ready(net_forward(x, kparams))
    ref = net_reference(x, params)
    assert out.shape == (B, NUM_CLASSES), out.shape
    err = float(jnp.max(jnp.abs(out - ref)))
    assert err < 1e-2, err

    # Larger batch -> streamed two-pass path (partial-sum stats + folded BN).
    B2 = MAX_TILE + 152
    x2 = jax.random.normal(k_x2, (B2, NUM_FEATURES), jnp.float32)
    out2 = jax.block_until_ready(net_forward(x2, kparams))
    ref2 = net_reference(x2, params)
    assert out2.shape == (B2, NUM_CLASSES), out2.shape
    err2 = float(jnp.max(jnp.abs(out2 - ref2)))
    assert err2 < 2.5e-2, err2

    print("KERNEL_OK")
</pallas_src>

<mosaic_0001>
module attributes {stable_mosaic.version = 11 : i64} {
  func.func @fused_kernel(%arg0: i32, %arg1: memref<8x96xbf16, #tpu.memory_space<vmem>>, %arg2: memref<96x512xbf16, #tpu.memory_space<vmem>>, %arg3: memref<1x512xf32, #tpu.memory_space<vmem>>, %arg4: memref<1x512xf32, #tpu.memory_space<vmem>>, %arg5: memref<1x512xf32, #tpu.memory_space<vmem>>, %arg6: memref<512x128xbf16, #tpu.memory_space<vmem>>, %arg7: memref<1x128xf32, #tpu.memory_space<vmem>>, %arg8: memref<128x16xbf16, #tpu.memory_space<vmem>>, %arg9: memref<1x16xf32, #tpu.memory_space<vmem>>, %arg10: memref<8x16xf32, #tpu.memory_space<vmem>>) attributes {dimension_semantics = [#tpu.dimension_semantics<arbitrary>], iteration_bounds = array<i64: 1>, scalar_prefetch = 0 : i64, scratch_operands = 0 : i64, tpu.core_type = #tpu.core_type<tc>, window_params = [{pipeline_mode = #tpu.pipeline_mode<synchronous>, transform_indices = @transform_0, window_bounds = array<i64: 8, 96>}, {pipeline_mode = #tpu.pipeline_mode<synchronous>, transform_indices = @transform_1, window_bounds = array<i64: 96, 512>}, {pipeline_mode = #tpu.pipeline_mode<synchronous>, transform_indices = @transform_2, window_bounds = array<i64: 1, 512>}, {pipeline_mode = #tpu.pipeline_mode<synchronous>, transform_indices = @transform_3, window_bounds = array<i64: 1, 512>}, {pipeline_mode = #tpu.pipeline_mode<synchronous>, transform_indices = @transform_4, window_bounds = array<i64: 1, 512>}, {pipeline_mode = #tpu.pipeline_mode<synchronous>, transform_indices = @transform_5, window_bounds = array<i64: 512, 128>}, {pipeline_mode = #tpu.pipeline_mode<synchronous>, transform_indices = @transform_6, window_bounds = array<i64: 1, 128>}, {pipeline_mode = #tpu.pipeline_mode<synchronous>, transform_indices = @transform_7, window_bounds = array<i64: 128, 16>}, {pipeline_mode = #tpu.pipeline_mode<synchronous>, transform_indices = @transform_8, window_bounds = array<i64: 1, 16>}, {pipeline_mode = #tpu.pipeline_mode<synchronous>, transform_indices = @transform_9, window_bounds = array<i64: 8, 16>}]} {
    %c0 = arith.constant 0 : index
    %c0_0 = arith.constant 0 : index
    %0 = vector.load %arg1[%c0, %c0_0] : memref<8x96xbf16, #tpu.memory_space<vmem>>, vector<8x96xbf16>
    %c0_1 = arith.constant 0 : index
    %c0_2 = arith.constant 0 : index
    %1 = vector.load %arg2[%c0_1, %c0_2] : memref<96x512xbf16, #tpu.memory_space<vmem>>, vector<96x512xbf16>
    %cst = arith.constant dense<0.000000e+00> : vector<8x512xf32>
    %2 = tpu.matmul %0, %1, %cst {dimension_numbers = #tpu.dot_dimension_numbers<[1], [0], [0], [1], [0, 0, 1, 1], [], []>} : vector<8x96xbf16>, vector<96x512xbf16>, vector<8x512xf32> -> vector<8x512xf32>
    %c0_3 = arith.constant 0 : index
    %c0_4 = arith.constant 0 : index
    %3 = vector.load %arg3[%c0_3, %c0_4] : memref<1x512xf32, #tpu.memory_space<vmem>>, vector<1x512xf32>
    %4 = vector.broadcast %3 : vector<1x512xf32> to vector<8x512xf32>
    %5 = arith.addf %2, %4 : vector<8x512xf32>
    %cst_5 = arith.constant 5.000000e-02 : f32
    %6 = vector.broadcast %cst_5 : f32 to vector<8x512xf32>
    %7 = arith.mulf %6, %5 : vector<8x512xf32>
    %8 = arith.maximumf %5, %7 : vector<8x512xf32>
    %cst_6 = arith.constant dense<0.000000e+00> : vector<512xf32>
    %9 = vector.multi_reduction <add>, %8, %cst_6 [0] : vector<8x512xf32> to vector<512xf32>
    %10 = vector.shape_cast %9 : vector<512xf32> to vector<1x512xf32>
    %cst_7 = arith.constant 1.250000e-01 : f32
    %11 = vector.broadcast %cst_7 : f32 to vector<1x512xf32>
    %12 = arith.mulf %10, %11 : vector<1x512xf32>
    %13 = arith.mulf %8, %8 : vector<8x512xf32>
    %cst_8 = arith.constant dense<0.000000e+00> : vector<512xf32>
    %14 = vector.multi_reduction <add>, %13, %cst_8 [0] : vector<8x512xf32> to vector<512xf32>
    %15 = vector.shape_cast %14 : vector<512xf32> to vector<1x512xf32>
    %cst_9 = arith.constant 1.250000e-01 : f32
    %16 = vector.broadcast %cst_9 : f32 to vector<1x512xf32>
    %17 = arith.mulf %15, %16 : vector<1x512xf32>
    %18 = arith.mulf %12, %12 : vector<1x512xf32>
    %19 = arith.subf %17, %18 : vector<1x512xf32>
    %cst_10 = arith.constant 0.000000e+00 : f32
    %20 = vector.broadcast %cst_10 : f32 to vector<1x512xf32>
    %21 = arith.maximumf %19, %20 : vector<1x512xf32>
    %c0_11 = arith.constant 0 : index
    %c0_12 = arith.constant 0 : index
    %22 = vector.load %arg4[%c0_11, %c0_12] : memref<1x512xf32, #tpu.memory_space<vmem>>, vector<1x512xf32>
    %cst_13 = arith.constant 9.99999974E-6 : f32
    %23 = vector.broadcast %cst_13 : f32 to vector<1x512xf32>
    %24 = arith.addf %21, %23 : vector<1x512xf32>
    %25 = math.rsqrt %24 : vector<1x512xf32>
    %26 = arith.mulf %22, %25 : vector<1x512xf32>
    %c0_14 = arith.constant 0 : index
    %c0_15 = arith.constant 0 : index
    %27 = vector.load %arg5[%c0_14, %c0_15] : memref<1x512xf32, #tpu.memory_space<vmem>>, vector<1x512xf32>
    %28 = arith.mulf %12, %26 : vector<1x512xf32>
    %29 = arith.subf %27, %28 : vector<1x512xf32>
    %30 = vector.broadcast %26 : vector<1x512xf32> to vector<8x512xf32>
    %31 = arith.mulf %8, %30 : vector<8x512xf32>
    %32 = vector.broadcast %29 : vector<1x512xf32> to vector<8x512xf32>
    %33 = arith.addf %31, %32 : vector<8x512xf32>
    %34 = arith.truncf %33 : vector<8x512xf32> to vector<8x512xbf16>
    %c0_16 = arith.constant 0 : index
    %c0_17 = arith.constant 0 : index
    %35 = vector.load %arg6[%c0_16, %c0_17] : memref<512x128xbf16, #tpu.memory_space<vmem>>, vector<512x128xbf16>
    %cst_18 = arith.constant dense<0.000000e+00> : vector<8x128xf32>
    %36 = tpu.matmul %34, %35, %cst_18 {dimension_numbers = #tpu.dot_dimension_numbers<[1], [0], [0], [1], [0, 0, 1, 1], [], []>} : vector<8x512xbf16>, vector<512x128xbf16>, vector<8x128xf32> -> vector<8x128xf32>
    %c0_19 = arith.constant 0 : index
    %c0_20 = arith.constant 0 : index
    %37 = vector.load %arg7[%c0_19, %c0_20] : memref<1x128xf32, #tpu.memory_space<vmem>>, vector<1x128xf32>
    %38 = vector.broadcast %37 : vector<1x128xf32> to vector<8x128xf32>
    %39 = arith.addf %36, %38 : vector<8x128xf32>
    %cst_21 = arith.constant 5.000000e-02 : f32
    %40 = vector.broadcast %cst_21 : f32 to vector<8x128xf32>
    %41 = arith.mulf %40, %39 : vector<8x128xf32>
    %42 = arith.maximumf %39, %41 : vector<8x128xf32>
    %43 = arith.truncf %42 : vector<8x128xf32> to vector<8x128xbf16>
    %c0_22 = arith.constant 0 : index
    %c0_23 = arith.constant 0 : index
    %44 = vector.load %arg8[%c0_22, %c0_23] : memref<128x16xbf16, #tpu.memory_space<vmem>>, vector<128x16xbf16>
    %cst_24 = arith.constant dense<0.000000e+00> : vector<8x16xf32>
    %45 = tpu.matmul %43, %44, %cst_24 {dimension_numbers = #tpu.dot_dimension_numbers<[1], [0], [0], [1], [0, 0, 1, 1], [], []>} : vector<8x128xbf16>, vector<128x16xbf16>, vector<8x16xf32> -> vector<8x16xf32>
    %c0_25 = arith.constant 0 : index
    %c0_26 = arith.constant 0 : index
    %46 = vector.load %arg9[%c0_25, %c0_26] : memref<1x16xf32, #tpu.memory_space<vmem>>, vector<1x16xf32>
    %47 = vector.broadcast %46 : vector<1x16xf32> to vector<8x16xf32>
    %48 = arith.addf %45, %47 : vector<8x16xf32>
    %c0_27 = arith.constant 0 : index
    %c0_28 = arith.constant 0 : index
    %49 = vector.load %arg10[%c0_27, %c0_28] : memref<8x16xf32, #tpu.memory_space<vmem>>, vector<8x16xf32>
    tpu.vector_store %arg10[%c0_27, %c0_28], %48 {strides = array<i32>} : memref<8x16xf32, #tpu.memory_space<vmem>>, vector<8x16xf32>,
    return
  }
  func.func @transform_0(%arg0: i32) -> (i32, i32) {
    %c0_i32 = arith.constant 0 : i32
    %c0_i32_0 = arith.constant 0 : i32
    %c0_i32_1 = arith.constant 0 : i32
    return %c0_i32, %c0_i32_0 : i32, i32
  }
  func.func @transform_1(%arg0: i32) -> (i32, i32) {
    %c0_i32 = arith.constant 0 : i32
    %c0_i32_0 = arith.constant 0 : i32
    %c0_i32_1 = arith.constant 0 : i32
    return %c0_i32, %c0_i32_0 : i32, i32
  }
  func.func @transform_2(%arg0: i32) -> (i32, i32) {
    %c0_i32 = arith.constant 0 : i32
    %c0_i32_0 = arith.constant 0 : i32
    %c0_i32_1 = arith.constant 0 : i32
    return %c0_i32, %c0_i32_0 : i32, i32
  }
  func.func @transform_3(%arg0: i32) -> (i32, i32) {
    %c0_i32 = arith.constant 0 : i32
    %c0_i32_0 = arith.constant 0 : i32
    %c0_i32_1 = arith.constant 0 : i32
    return %c0_i32, %c0_i32_0 : i32, i32
  }
  func.func @transform_4(%arg0: i32) -> (i32, i32) {
    %c0_i32 = arith.constant 0 : i32
    %c0_i32_0 = arith.constant 0 : i32
    %c0_i32_1 = arith.constant 0 : i32
    return %c0_i32, %c0_i32_0 : i32, i32
  }
  func.func @transform_5(%arg0: i32) -> (i32, i32) {
    %c0_i32 = arith.constant 0 : i32
    %c0_i32_0 = arith.constant 0 : i32
    %c0_i32_1 = arith.constant 0 : i32
    return %c0_i32, %c0_i32_0 : i32, i32
  }
  func.func @transform_6(%arg0: i32) -> (i32, i32) {
    %c0_i32 = arith.constant 0 : i32
    %c0_i32_0 = arith.constant 0 : i32
    %c0_i32_1 = arith.constant 0 : i32
    return %c0_i32, %c0_i32_0 : i32, i32
  }
  func.func @transform_7(%arg0: i32) -> (i32, i32) {
    %c0_i32 = arith.constant 0 : i32
    %c0_i32_0 = arith.constant 0 : i32
    %c0_i32_1 = arith.constant 0 : i32
    return %c0_i32, %c0_i32_0 : i32, i32
  }
  func.func @transform_8(%arg0: i32) -> (i32, i32) {
    %c0_i32 = arith.constant 0 : i32
    %c0_i32_0 = arith.constant 0 : i32
    %c0_i32_1 = arith.constant 0 : i32
    return %c0_i32, %c0_i32_0 : i32, i32
  }
  func.func @transform_9(%arg0: i32) -> (i32, i32) {
    %c0_i32 = arith.constant 0 : i32
    %c0_i32_0 = arith.constant 0 : i32
    %c0_i32_1 = arith.constant 0 : i32
    return %c0_i32, %c0_i32_0 : i32, i32
  }
}

</mosaic_0001>

<bundles_post_ra>
// kernel: net_forward.1
= control target key start
LH: loop header
LB: loop body
LE: loop exit
PB: predicated region body
PF: predicated region fallthrough
CT: control target
= control target key end

     0   :  { %14 = vsyncpa [#allocation3], 0  ;;  %s1521_s0 = inlined_call_operand.vmem [shape: bf16[8,96], index: 0, kind: input, shape index: {}]   ;;  %s1522_s1 = inlined_call_operand.hbm [shape: bf16[96,512], index: 1, kind: input, shape index: {}]   ;;  %s1523_s2 = inlined_call_operand.vmem [shape: f32[1,512], index: 2, kind: input, shape index: {}]   ;;  %s1524_s3 = inlined_call_operand.vmem [shape: f32[1,512], index: 3, kind: input, shape index: {}]   ;;  %s1525_s4 = inlined_call_operand.vmem [shape: f32[1,512], index: 4, kind: input, shape index: {}]   ;;  %s1526_s5 = inlined_call_operand.hbm [shape: bf16[512,128], index: 5, kind: input, shape index: {}]   ;;  %s1527_s6 = inlined_call_operand.vmem [shape: f32[1,128], index: 6, kind: input, shape index: {}]   ;;  %s1528_s7 = inlined_call_operand.vmem [shape: bf16[128,16], index: 7, kind: input, shape index: {}]   ;;  %s1529_s8 = inlined_call_operand.vmem [shape: f32[1,16], index: 8, kind: input, shape index: {}]   ;;  %s1530_s9 = inlined_call_operand.hbm [shape: f32[8,16], index: 9, kind: output, shape index: {}]  }
   0x1   :  { %15 = vsyncpa [#allocation6], 0 }
   0x2   :  { %16 = vsyncpa [#allocation4], 0  ;;  %s1306_s30 = smov [#allocation2]   ;;  %s1234_s13 = scalar_lea.hbm %s1522_s1, 3072 }
   0x3   :  { %s24_s10 = sshll.u32 %s1306_s30, 4  ;;  %p1235_p0 = scmp.ne.s32.totalorder %s1522_s1, %s1234_s13  ;;  %s25_s10 = int_to_ptr.vmem [resolvable:$true] %s24_s10 }
   0x4   :  { %p1238_p1 = scmp.lt.u32.totalorder %s1234_s13, %s1522_s1 }
   0x6   :  { %p1240_p2 = pnand %p1238_p1, %p1235_p0 }
   0x8   :  { %1243 = shalt.err (!%p1240_p2)
}
   0x9   :  { %s1244_s18 = scalar_lea.vmem %s25_s10, 3072  ;;  %p1249_p4 = scmp.lt.s32.totalorder %s25_s10, %s25_s10 }
   0xa   :  { %p1245_p3 = scmp.ne.s32.totalorder %s25_s10, %s1244_s18  ;;  %p1250_p5 = scmp.lt.s32.totalorder %s1244_s18, %s1244_s18 }
   0xc   :  { %p1251_p6 = por %p1250_p5, %p1249_p4 }
   0xe   :  { %p1252_p7 = pnand %p1251_p6, %p1245_p3 }
  0x10   :  { %1255 = shalt.err (!%p1252_p7)
}
  0x11   :  { %s1307_s19 = smov 256   ;;  %s1308_s20 = smov 16  }
  0x12   :  { %30 = dma.hbm_to_vmem [thread:$0]  %s1522_s1, 3072, %s25_s10, [#allocation3], %s1307_s19, %s1307_s19, %s1308_s20  }
  0x13   :  { %s1309_s23 = smov [#allocation5]   ;;  %s1256_s27 = scalar_lea.hbm %s1526_s5, 4096 }
  0x14   :  { %s42_s24 = sshll.u32 %s1309_s23, 4  ;;  %p1257_p8 = scmp.ne.s32.totalorder %s1526_s5, %s1256_s27  ;;  %s43_s24 = int_to_ptr.vmem [resolvable:$true] %s42_s24 }
  0x15   :  { %p1260_p9 = scmp.lt.u32.totalorder %s1256_s27, %s1526_s5 }
  0x17   :  { %p1262_p10 = pnand %p1260_p9, %p1257_p8 }
  0x19   :  { %1265 = shalt.err (!%p1262_p10)
}
  0x1a   :  { %s1266_s12 = scalar_lea.vmem %s43_s24, 4096  ;;  %p1271_p12 = scmp.lt.s32.totalorder %s43_s24, %s43_s24 }
  0x1b   :  { %p1267_p11 = scmp.ne.s32.totalorder %s43_s24, %s1266_s12  ;;  %p1272_p13 = scmp.lt.s32.totalorder %s1266_s12, %s1266_s12 }
  0x1d   :  { %p1273_p0 = por %p1272_p13, %p1271_p12 }
  0x1f   :  { %p1274_p1 = pnand %p1273_p0, %p1267_p11 }
  0x21   :  { %1277 = shalt.err (!%p1274_p1)
}
  0x22   :  { %s1310_s1 = smov 64   ;;  %s1311_s10 = smov 4  }
  0x23   :  { %48 = dma.hbm_to_vmem [thread:$0]  %s1526_s5, 4096, %s43_s24, [#allocation6], %s1310_s1, %s1310_s1, %s1311_s10  }
  0x24   :  { %1300 = dma.done.wait [#allocation3], 3072  }
  0x25   :  { %1301 = vsyncadd [#allocation3], 4294964224 }
  0x26   :  { %1302 = dma.done.wait [#allocation6], 4096  }
  0x27   :  { %1303 = vsyncadd [#allocation6], 4294963200  ;;  %v1312_v0 = vmov 0   ;;  %v1150_v1 = vld [vmem:[#allocation2 + $0x4] ss:$16 sps:$4 sm:$0xff]   ;;  %vm229_vm0 = vcmask 785408   ;;  %v89_v59 = vlaneseq }
  0x28   :  { %265 = vmatprep.mubr.bf16.mxu1 %v1312_v0  ;;  %v1152_v2 = vld [vmem:[#allocation2] ss:$16 sps:$4 sm:$0xff]   ;;  %233 = vmatprep.subr.bf16.mxu1 %v1150_v1  ;;  %v1153_v3 = vld [vmem:[#allocation2 + $0x24] ss:$16 sps:$4 sm:$0xff]   ;;  %v1170_v13 = vld [vmem:[#allocation2 + $0xc] ss:$16 sps:$4 sm:$0xff]  }
  0x29   :  { %234 = vmatpush1.bf16.msra.mxu1 %v1152_v2  ;;  %v1155_v4 = vld [vmem:[#allocation2 + $0x20] ss:$16 sps:$4 sm:$0xff]   ;;  %v1156_v5 = vld [vmem:[#allocation2 + $0x44] ss:$16 sps:$4 sm:$0xff]   ;;  %v1168_v15 = vld [vmem:[#allocation2 + $0x8] ss:$16 sps:$4 sm:$0xff]  }
  0x2a   :  { %235 = vmatprep.subr.bf16.mxu1 %v1153_v3  ;;  %v1158_v6 = vld [vmem:[#allocation2 + $0x40] ss:$16 sps:$4 sm:$0xff]   ;;  %v1159_v7 = vld [vmem:[#allocation2 + $0x64] ss:$16 sps:$4 sm:$0xff]   ;;  %v1173_v16 = vld [vmem:[#allocation2 + $0x2c] ss:$16 sps:$4 sm:$0xff]  }
  0x2b   :  { %v1161_v8 = vld [vmem:[#allocation2 + $0x60] ss:$16 sps:$4 sm:$0xff]   ;;  %v1162_v9 = vld [vmem:[#allocation2 + $0x84] ss:$16 sps:$4 sm:$0xff]   ;;  %v1171_v17 = vld [vmem:[#allocation2 + $0x28] ss:$16 sps:$4 sm:$0xff]  }
  0x2c   :  { %v1164_v10 = vld [vmem:[#allocation2 + $0x80] ss:$16 sps:$4 sm:$0xff]   ;;  %v1165_v11 = vld [vmem:[#allocation2 + $0xa4] ss:$16 sps:$4 sm:$0xff]   ;;  %v1176_v18 = vld [vmem:[#allocation2 + $0x4c] ss:$16 sps:$4 sm:$0xff]  }
  0x2d   :  { %236 = vmatpush1.bf16.msra.mxu1 %v1155_v4  ;;  %v1167_v12 = vld [vmem:[#allocation2 + $0xa0] ss:$16 sps:$4 sm:$0xff]   ;;  %v1174_v19 = vld [vmem:[#allocation2 + $0x48] ss:$16 sps:$4 sm:$0xff]   ;;  %v1179_v20 = vld [vmem:[#allocation2 + $0x6c] ss:$16 sps:$4 sm:$0xff]  }
  0x2e   :  { %237 = vmatprep.subr.bf16.mxu1 %v1156_v5  ;;  %v62_v14 = vld [vmem:[%s1521_s0] sm:$0xf]  ;;  %v1177_v21 = vld [vmem:[#allocation2 + $0x68] ss:$16 sps:$4 sm:$0xff]   ;;  %v1182_v22 = vld [vmem:[#allocation2 + $0x8c] ss:$16 sps:$4 sm:$0xff]  }
  0x2f   :  { %v1180_v23 = vld [vmem:[#allocation2 + $0x88] ss:$16 sps:$4 sm:$0xff]   ;;  %v1185_v24 = vld [vmem:[#allocation2 + $0xac] ss:$16 sps:$4 sm:$0xff]   ;;  %v1186_v26 = vld [vmem:[#allocation5 + $0x40] sm:$0xff]   ;;  %v1313_v58 = vmov 0.0  }
  0x30   :  { %v1183_v25 = vld [vmem:[#allocation2 + $0xa8] ss:$16 sps:$4 sm:$0xff]   ;;  %v1187_v27 = vld [vmem:[#allocation5 + $0xc0] sm:$0xff]   ;;  %1066 = vmatprep.subr.bf16.mxu0 %v1186_v26  ;;  %v1194_v34 = vld [vmem:[#allocation5 + $0x50] sm:$0xff]   ;;  %v1397_v60 = vshrl.u32 %v89_v59, 7  ;;  %vm1315_vm1 = vmmov 0  }
  0x31   :  { %238 = vmatpush1.bf16.msra.mxu1 %v1158_v6  ;;  %v1188_v28 = vld [vmem:[#allocation5] sm:$0xff]   ;;  %v1190_v30 = vld [vmem:[#allocation5 + $0x48] sm:$0xff]   ;;  %v1195_v35 = vld [vmem:[#allocation5 + $0xd0] sm:$0xff]   ;;  %s1316_s5 = smov [#allocation7]   ;;  %vm980_vm2 = vcmask 130048  }
  0x32   :  { %239 = vmatprep.subr.bf16.mxu1 %v1159_v7  ;;  %v1189_v29 = vld [vmem:[#allocation5 + $0x80] sm:$0xff]   ;;  %v1191_v31 = vld [vmem:[#allocation5 + $0xc8] sm:$0xff]   ;;  %1067 = vmatpush3.bf16.msra.mxu0 %v1188_v28  ;;  %v1196_v36 = vld [vmem:[#allocation5 + $0x10] sm:$0xff]   ;;  %v1400_v61 = vsub.s32 0, %v1397_v60  ;;  %v1406_v63 = vsub.s32 1, %v1397_v60 }
  0x33   :  { %v1192_v32 = vld [vmem:[#allocation5 + $0x8] sm:$0xff]   ;;  %1068 = vmatprep.subr.bf16.mxu0 %v1190_v30  ;;  %v1197_v37 = vld [vmem:[#allocation5 + $0x90] sm:$0xff]   ;;  %v1198_v38 = vld [vmem:[#allocation5 + $0x58] sm:$0xff]  }
  0x34   :  { %v1193_v33 = vld [vmem:[#allocation5 + $0x88] sm:$0xff]   ;;  %v1199_v39 = vld [vmem:[#allocation5 + $0xd8] sm:$0xff]   ;;  %v1202_v42 = vld [vmem:[#allocation5 + $0x60] sm:$0xff]  }
  0x35   :  { %240 = vmatpush1.bf16.msra.mxu1 %v1161_v8  ;;  %v1200_v40 = vld [vmem:[#allocation5 + $0x18] sm:$0xff]   ;;  %v1203_v43 = vld [vmem:[#allocation5 + $0xe0] sm:$0xff]   ;;  %v1206_v46 = vld [vmem:[#allocation5 + $0x68] sm:$0xff]  }
  0x36   :  { %241 = vmatprep.subr.bf16.mxu1 %v1162_v9  ;;  %1069 = vmatpush3.bf16.msra.mxu0 %v1192_v32  ;;  %v1201_v41 = vld [vmem:[#allocation5 + $0x98] sm:$0xff]   ;;  %v1204_v44 = vld [vmem:[#allocation5 + $0x20] sm:$0xff]   ;;  %v1207_v47 = vld [vmem:[#allocation5 + $0xe8] sm:$0xff]  }
  0x37   :  { %1070 = vmatprep.subr.bf16.mxu0 %v1194_v34  ;;  %v1205_v45 = vld [vmem:[#allocation5 + $0xa0] sm:$0xff]   ;;  %v1208_v48 = vld [vmem:[#allocation5 + $0x28] sm:$0xff]   ;;  %v1210_v50 = vld [vmem:[#allocation5 + $0x70] sm:$0xff]  }
  0x38   :  { %v1209_v49 = vld [vmem:[#allocation5 + $0xa8] sm:$0xff]   ;;  %v1211_v51 = vld [vmem:[#allocation5 + $0xf0] sm:$0xff]   ;;  %v1214_v54 = vld [vmem:[#allocation5 + $0x78] sm:$0xff]  }
  0x39   :  { %242 = vmatpush1.bf16.msra.mxu1 %v1164_v10  ;;  %v1212_v52 = vld [vmem:[#allocation5 + $0x30] sm:$0xff]   ;;  %v1215_v55 = vld [vmem:[#allocation5 + $0xf8] sm:$0xff]   ;;  %v87_v62 = vld [vmem:[%s1523_s2] sm:$0xf] }
  0x3a   :  { %243 = vmatprep.subr.bf16.mxu1 %v1165_v11  ;;  %1071 = vmatpush3.bf16.msra.mxu0 %v1196_v36  ;;  %v1213_v53 = vld [vmem:[#allocation5 + $0xb0] sm:$0xff]   ;;  %v1216_v56 = vld [vmem:[#allocation5 + $0x38] sm:$0xff]   ;;  %v96_v1 = vrot.slane %v87_v62, %v1406_v63  ;;  %v1426_v36 = vsub.s32 3, %v1397_v60 }
  0x3b   :  { %1072 = vmatprep.subr.bf16.mxu0 %v1198_v38  ;;  %v1217_v57 = vld [vmem:[#allocation5 + $0xb8] sm:$0xff]  }
  0x3d   :  { %244 = vmatpush1.bf16.msra.mxu1 %v1167_v12 }
  0x3e   :  { %274 = vmatprep.subr.bf16.mxu1 %v1170_v13  ;;  %1073 = vmatpush3.bf16.msra.mxu0 %v1200_v40 }
  0x3f   :  { %1074 = vmatprep.subr.bf16.mxu0 %v1202_v42 }
  0x40   :  { %1022 = vmatmul.mubr.msk.bf16.vlgmr.msra.gmra.mrb[0].mxu1 %vm229_vm0, %v62_v14 }
  0x41   :  { %275 = vmatpush1.bf16.msra.mxu1 %v1168_v15  ;;  %306 = vmatprep.mubr.bf16.mxu1 %v1312_v0  ;;  %v92_v0 = vrot.slane %v87_v62, %v1400_v61 }
  0x42   :  { %276 = vmatprep.subr.bf16.mxu1 %v1173_v16  ;;  %1075 = vmatpush3.bf16.msra.mxu0 %v1204_v44 }
  0x43   :  { %1076 = vmatprep.subr.bf16.mxu0 %v1206_v46 }
  0x45   :  { %277 = vmatpush1.bf16.msra.mxu1 %v1171_v17 }
  0x46   :  { %278 = vmatprep.subr.bf16.mxu1 %v1176_v18  ;;  %1077 = vmatpush3.bf16.msra.mxu0 %v1208_v48 }
  0x47   :  { %1078 = vmatprep.subr.bf16.mxu0 %v1210_v50 }
  0x49   :  { %279 = vmatpush1.bf16.msra.mxu1 %v1174_v19 }
  0x4a   :  { %280 = vmatprep.subr.bf16.mxu1 %v1179_v20  ;;  %1079 = vmatpush3.bf16.msra.mxu0 %v1212_v52 }
  0x4b   :  { %1080 = vmatprep.subr.bf16.mxu0 %v1214_v54 }
  0x4d   :  { %281 = vmatpush1.bf16.msra.mxu1 %v1177_v21 }
  0x4e   :  { %282 = vmatprep.subr.bf16.mxu1 %v1182_v22  ;;  %1081 = vmatpush3.bf16.msra.mxu0 %v1216_v56 }
  0x4f   :  { %1119 = vmatprep.subr.bf16.mxu0 %v1313_v58 }
  0x51   :  { %283 = vmatpush1.bf16.msra.mxu1 %v1180_v23 }
  0x52   :  { %284 = vmatprep.subr.bf16.mxu1 %v1185_v24 }
  0x55   :  { %285 = vmatpush1.bf16.msra.mxu1 %v1183_v25 }
  0x56   :  { %1088 = vmatprep.subr.bf16.mxu1 %v1187_v27 }
  0x58   :  { %1023 = vmatmul.mubr.msk.bf16.vlgmr.msra.gmra.mrb[4].mxu1 %vm229_vm0, %v62_v14 }
  0x59   :  { %1089 = vmatpush3.bf16.msra.mxu1 %v1189_v29 }
  0x5a   :  { %1090 = vmatprep.subr.bf16.mxu1 %v1191_v31 }
  0x5d   :  { %1091 = vmatpush3.bf16.msra.mxu1 %v1193_v33  ;;  %v1423_v33 = vsub.s32 2, %v1397_v60 }
  0x5e   :  { %1092 = vmatprep.subr.bf16.mxu1 %v1195_v35 }
  0x61   :  { %1093 = vmatpush3.bf16.msra.mxu1 %v1197_v37 }
  0x62   :  { %1094 = vmatprep.subr.bf16.mxu1 %v1199_v39 }
  0x65   :  { %1095 = vmatpush3.bf16.msra.mxu1 %v1201_v41 }
  0x66   :  { %1096 = vmatprep.subr.bf16.mxu1 %v1203_v43  ;;  %v100_v43 = vrot.slane %v87_v62, %v1423_v33 }
  0x69   :  { %1097 = vmatpush3.bf16.msra.mxu1 %v1205_v45  ;;  %v104_v45 = vrot.slane %v87_v62, %v1426_v36 }
  0x6a   :  { %1098 = vmatprep.subr.bf16.mxu1 %v1207_v47 }
  0x6d   :  { %1099 = vmatpush3.bf16.msra.mxu1 %v1209_v49 }
  0x6e   :  { %1100 = vmatprep.subr.bf16.mxu1 %v1211_v51 }
  0x71   :  { %1101 = vmatpush3.bf16.msra.mxu1 %v1213_v53 }
  0x72   :  { %1102 = vmatprep.subr.bf16.mxu1 %v1215_v55 }
  0x75   :  { %1103 = vmatpush3.bf16.msra.mxu1 %v1217_v57 }
 0x113   :  { %v267_v2 = vpop.f32.mrb[0].mxu1 }
 0x114   :  { %v268_v3 = vadd.f32 %v267_v2, %v92_v0  ;;  %v269_v4 = vpop.f32.mrb[1].mxu1 }
 0x115   :  { %v270_v5 = vadd.f32 %v269_v4, %v96_v1  ;;  %v271_v6 = vpop.f32.mrb[2].mxu1 }
 0x116   :  { %v315_v7 = vmul.f32 0.05, %v268_v3  ;;  %v272_v8 = vpop.f32.mrb[3].mxu1 }
 0x117   :  { %v316_v9 = vmul.f32 0.05, %v270_v5 }
 0x118   :  { %v1410_v10 = vmax.f32 %v268_v3, %v315_v7 }
 0x119   :  { %v1412_v11 = vmax.f32 %v270_v5, %v316_v9 }
 0x11a   :  { %v323_v12 = vrot.slane %v1410_v10, 4  ;;  %v351_v13 = vmul.f32 %v1410_v10, %v1410_v10 }
 0x11b   :  { %v329_v14 = vrot.slane %v1412_v11, 4  ;;  %v352_v15 = vmul.f32 %v1412_v11, %v1412_v11 }
 0x11c   :  { %v324_v16 = vadd.f32 %v323_v12, %v1410_v10  ;;  %v355_v17 = vrot.slane %v351_v13, 4 }
 0x11d   :  { %v330_v18 = vadd.f32 %v329_v14, %v1412_v11  ;;  %v361_v19 = vrot.slane %v352_v15, 4 }
 0x11e   :  { %v325_v20 = vrot.slane %v324_v16, 2  ;;  %v356_v21 = vadd.f32 %v355_v17, %v351_v13 }
 0x11f   :  { %v331_v22 = vrot.slane %v330_v18, 2  ;;  %v362_v23 = vadd.f32 %v361_v19, %v352_v15 }
 0x120   :  { %v326_v24 = vadd.f32 %v325_v20, %v324_v16  ;;  %v357_v25 = vrot.slane %v356_v21, 2 }
 0x121   :  { %v363_v26 = vrot.slane %v362_v23, 2  ;;  %v332_v27 = vadd.f32 %v331_v22, %v330_v18 }
 0x122   :  { %v327_v28 = vrot.slane %v326_v24, 1  ;;  %v358_v29 = vadd.f32 %v357_v25, %v356_v21 }
 0x123   :  { %v364_v30 = vadd.f32 %v363_v26, %v362_v23  ;;  %v333_v31 = vrot.slane %v332_v27, 1 }
 0x124   :  { %v359_v32 = vrot.slane %v358_v29, 1  ;;  %v328_v34 = vadd.f32 %v327_v28, %v326_v24 }
 0x125   :  { %v365_v35 = vrot.slane %v364_v30, 1  ;;  %v334_v37 = vadd.f32 %v333_v31, %v332_v27 }
 0x126   :  { %v360_v38 = vadd.f32 %v359_v32, %v358_v29  ;;  %v1428_v39 = vmul.f32 0.125, %v328_v34 }
 0x127   :  { %v1430_v40 = vmul.f32 0.125, %v334_v37  ;;  %v366_v41 = vadd.f32 %v365_v35, %v364_v30 }
 0x128   :  { %v379_v42 = vmul.f32 0.125, %v360_v38  ;;  %v383_v44 = vmul.f32 %v1428_v39, %v1428_v39 }
 0x129   :  { %v380_v46 = vmul.f32 0.125, %v366_v41  ;;  %v384_v47 = vmul.f32 %v1430_v40, %v1430_v40 }
 0x12a   :  { %v387_v48 = vsub.f32 %v379_v42, %v383_v44 }
 0x12b   :  { %v308_v49 = vpop.f32.mrb[4].mxu1  ;;  %v388_v50 = vsub.f32 %v380_v46, %v384_v47 }
 0x12c   :  { %v309_v51 = vadd.f32 %v308_v49, %v100_v43  ;;  %v310_v52 = vpop.f32.mrb[5].mxu1  ;;  %v391_v53 = vmax.f32 %v387_v48, 0.0 }
 0x12d   :  { %v311_v54 = vadd.f32 %v310_v52, %v104_v45  ;;  %v312_v55 = vpop.f32.mrb[6].mxu1  ;;  %v392_v56 = vmax.f32 %v388_v50, 0.0 }
 0x12e   :  { %v317_v57 = vmul.f32 0.05, %v309_v51  ;;  %v313_v59 = vpop.f32.mrb[7].mxu1  ;;  %v396_v0 = vadd.f32 1e-05, %v391_v53 }
 0x12f   :  { %v318_v1 = vmul.f32 0.05, %v311_v54  ;;  %v397_v2 = vadd.f32 1e-05, %v392_v56 }
 0x130   :  { %v1438_v3 = vmax.f32 %v309_v51, %v317_v57  ;;  %1226 = vrsqrt.f32 %v396_v0  ;;  %v1314_v51 = vmov 1966171168  }
 0x131   :  { %v1440_v62 = vmax.f32 %v311_v54, %v318_v1  ;;  %1228 = vrsqrt.f32 %v397_v2  ;;  %v411_v52 = vunpack.c.l.s4 %v1314_v51  ;;  %v395_v2 = vld [vmem:[%s1524_s3] sm:$0xf] }
 0x132   :  { %v335_v4 = vrot.slane %v1438_v3, 4  ;;  %v353_v5 = vmul.f32 %v1438_v3, %v1438_v3 }
 0x133   :  { %v341_v6 = vrot.slane %v1440_v62, 4  ;;  %v354_v7 = vmul.f32 %v1440_v62, %v1440_v62  ;;  %v412_v53 = vunpack.c.0.s8 %v411_v52 }
 0x134   :  { %v336_v8 = vadd.f32 %v335_v4, %v1438_v3  ;;  %v367_v9 = vrot.slane %v353_v5, 4 }
 0x135   :  { %v342_v12 = vadd.f32 %v341_v6, %v1440_v62  ;;  %v373_v13 = vrot.slane %v354_v7, 4  ;;  %v415_v55 = vsub.s32 %v412_v53, %v1397_v60 }
 0x136   :  { %v337_v14 = vrot.slane %v336_v8, 2  ;;  %v368_v15 = vadd.f32 %v367_v9, %v353_v5 }
 0x137   :  { %v343_v16 = vrot.slane %v342_v12, 2  ;;  %v374_v17 = vadd.f32 %v373_v13, %v354_v7 }
 0x138   :  { %v338_v18 = vadd.f32 %v337_v14, %v336_v8  ;;  %v369_v19 = vrot.slane %v368_v15, 2 }
 0x139   :  { %v344_v20 = vadd.f32 %v343_v16, %v342_v12  ;;  %v375_v21 = vrot.slane %v374_v17, 2 }
 0x13a   :  { %v1227_v22 = vpop.eup %1226  ;;  %v339_v23 = vrot.slane %v338_v18, 1  ;;  %v370_v24 = vadd.f32 %v369_v19, %v368_v15 }
 0x13b   :  { %v1229_v25 = vpop.eup %1228  ;;  %v345_v26 = vrot.slane %v344_v20, 1  ;;  %v376_v27 = vadd.f32 %v375_v21, %v374_v17 }
 0x13c   :  { %v340_v28 = vadd.f32 %v339_v23, %v338_v18  ;;  %v371_v29 = vrot.slane %v370_v24, 1  ;;  %v408_v30 = vcombine.low %v1227_v22, %v1229_v25 }
 0x13d   :  { %v346_v31 = vadd.f32 %v345_v26, %v344_v20  ;;  %v377_v32 = vrot.slane %v376_v27, 1 }
 0x13e   :  { %v349_v34 = vmul.f32 0.125, %v340_v28  ;;  %v372_v35 = vadd.f32 %v371_v29, %v370_v24  ;;  %v416_v59 = vrot.slane %v408_v30, %v415_v55 }
 0x13f   :  { %v350_v37 = vmul.f32 0.125, %v346_v31  ;;  %v378_v38 = vadd.f32 %v377_v32, %v376_v27 }
 0x140   :  { %v381_v41 = vmul.f32 0.125, %v372_v35  ;;  %v385_v42 = vmul.f32 %v349_v34, %v349_v34  ;;  %v1223_v35 = vld [vmem:[%s1528_s7 + $0x28] sm:$0xff]  }
 0x141   :  { %v382_v43 = vmul.f32 0.125, %v378_v38  ;;  %v386_v44 = vmul.f32 %v350_v37, %v350_v37  ;;  %v1225_v38 = vld [vmem:[%s1528_s7 + $0x38] sm:$0xff]  }
 0x142   :  { %v389_v45 = vsub.f32 %v381_v41, %v385_v42 }
 0x143   :  { %v390_v46 = vsub.f32 %v382_v43, %v386_v44  ;;  %v1024_v43 = vld [vmem:[%s1527_s6] ss:$0 sm:$0xff]  ;;  %s988_s6 = sshll.u32 %s1316_s5, 4  ;;  %s989_s6 = int_to_ptr.vmem [resolvable:$true] %s988_s6 }
 0x144   :  { %v393_v47 = vmax.f32 %v389_v45, 0.0  ;;  %s1278_s15 = scalar_lea.vmem %s989_s6, 128  ;;  %p1283_p3 = scmp.lt.s32.totalorder %s989_s6, %s989_s6 }
 0x145   :  { %v394_v48 = vmax.f32 %v390_v46, 0.0  ;;  %p1279_p2 = scmp.ne.s32.totalorder %s989_s6, %s1278_s15  ;;  %p1284_p4 = scmp.lt.s32.totalorder %s1278_s15, %s1278_s15 }
 0x146   :  { %v398_v49 = vadd.f32 1e-05, %v393_v47 }
 0x147   :  { %v399_v50 = vadd.f32 1e-05, %v394_v48  ;;  %p1285_p5 = por %p1284_p4, %p1283_p3 }
 0x148   :  { %1230 = vrsqrt.f32 %v398_v49 }
 0x149   :  { %1232 = vrsqrt.f32 %v399_v50  ;;  %p1286_p6 = pnand %p1285_p5, %p1279_p2 }
 0x152   :  { %v1231_v54 = vpop.eup %1230 }
 0x153   :  { %v1233_v56 = vpop.eup %1232 }
 0x154   :  { %v409_v57 = vcombine.low %v1231_v54, %v1233_v56 }
 0x156   :  { %v423_v0 = vrot.slane %v409_v57, %v415_v55 }
 0x158   :  { %v424_v1 = vcombine.low %v416_v59, %v423_v0 }
 0x15a   :  { %v431_v4 = vrot.slane %v424_v1, %v415_v55 }
 0x15c   :  { %v433_v5 = vmul.f32 %v431_v4, %v395_v2 }
 0x15e   :  { %v439_v6 = vrot.slane %v433_v5, %v1400_v61  ;;  %v443_v7 = vrot.slane %v433_v5, %v1406_v63  ;;  %v447_v8 = vrot.slane %v433_v5, %v1423_v33  ;;  %v451_v9 = vrot.slane %v433_v5, %v1426_v36 }
 0x160   :  { %v456_v60 = vmul.f32 %v439_v6, %v1428_v39  ;;  %v457_v12 = vmul.f32 %v443_v7, %v1430_v40  ;;  %v458_v13 = vmul.f32 %v447_v8, %v349_v34  ;;  %v459_v14 = vmul.f32 %v451_v9, %v350_v37  ;;  %v434_v39 = vld [vmem:[%s1525_s4] sm:$0xf]  ;;  %v1224_v37 = vld [vmem:[%s1528_s7 + $0x30] sm:$0xff]  }
 0x161   :  { %v491_v15 = vmul.f32 %v443_v7, %v1412_v11  ;;  %v493_v16 = vmul.f32 %v451_v9, %v1440_v62  ;;  %v490_v17 = vmul.f32 %v439_v6, %v1410_v10  ;;  %v492_v18 = vmul.f32 %v447_v8, %v1438_v3  ;;  %v1218_v34 = vld [vmem:[%s1528_s7] sm:$0xff]  }
 0x162   :  { %v464_v19 = vcombine.low %v456_v60, %v457_v12  ;;  %v465_v20 = vcombine.low %v458_v13, %v459_v14 }
 0x164   :  { %v472_v21 = vrot.slane %v464_v19, %v415_v55  ;;  %v479_v22 = vrot.slane %v465_v20, %v415_v55 }
 0x166   :  { %v480_v23 = vcombine.low %v472_v21, %v479_v22 }
 0x168   :  { %v487_v40 = vrot.slane %v480_v23, %v415_v55 }
 0x16a   :  { %v489_v24 = vsub.f32 %v434_v39, %v487_v40 }
 0x16c   :  { %v502_v25 = vrot.slane %v489_v24, %v1406_v63  ;;  %v510_v11 = vrot.slane %v489_v24, %v1426_v36  ;;  %v498_v62 = vrot.slane %v489_v24, %v1400_v61  ;;  %v506_v10 = vrot.slane %v489_v24, %v1423_v33  ;;  %v1219_v61 = vld [vmem:[%s1528_s7 + $0x8] sm:$0xff]   ;;  %v1220_v63 = vld [vmem:[%s1528_s7 + $0x10] sm:$0xff]   ;;  %v1221_v33 = vld [vmem:[%s1528_s7 + $0x18] sm:$0xff]  }
 0x16d   :  { %v1222_v36 = vld [vmem:[%s1528_s7 + $0x20] sm:$0xff]  }
 0x16e   :  { %v516_v3 = vadd.f32 %v502_v25, %v491_v15  ;;  %v518_v26 = vadd.f32 %v510_v11, %v493_v16  ;;  %v515_v27 = vadd.f32 %v498_v62, %v490_v17  ;;  %v517_v28 = vadd.f32 %v506_v10, %v492_v18 }
 0x170   :  { %v520_v29 = vpack.c.bf16 %v516_v3, %v516_v3  ;;  %v522_v30 = vpack.c.bf16 %v518_v26, %v518_v26  ;;  %v519_v31 = vpack.c.bf16 %v515_v27, %v515_v27  ;;  %v521_v32 = vpack.c.bf16 %v517_v28, %v517_v28 }
 0x172   :  { %818 = vmatprep.mubr.bf16.mxu0 %v520_v29  ;;  %858 = vmatprep.mubr.bf16.mxu1 %v522_v30 }
 0x173   :  { %819 = vmatmul.mubr.bf16.vlgmr.msra.gmra.mrb[0].mxu0 %v519_v31  ;;  %859 = vmatmul.mubr.bf16.vlgmr.msra.gmra.mrb[8].mxu1 %v521_v32 }
 0x174   :  { %1120 = vmatpush3.bf16.msra.mxu0 %v1218_v34  ;;  %1135 = vmatprep.mubr.msk.bf16.mxu0 %vm1315_vm1, %v1313_v58 }
 0x175   :  { %1121 = vmatprep.subr.bf16.mxu0 %v1313_v58 }
 0x178   :  { %1122 = vmatpush3.bf16.msra.mxu0 %v1219_v61 }
 0x179   :  { %1123 = vmatprep.subr.bf16.mxu0 %v1313_v58 }
 0x17c   :  { %1124 = vmatpush3.bf16.msra.mxu0 %v1220_v63 }
 0x17d   :  { %1125 = vmatprep.subr.bf16.mxu0 %v1313_v58 }
 0x180   :  { %1126 = vmatpush3.bf16.msra.mxu0 %v1221_v33 }
 0x181   :  { %1127 = vmatprep.subr.bf16.mxu0 %v1313_v58 }
 0x184   :  { %1128 = vmatpush3.bf16.msra.mxu0 %v1222_v36 }
 0x185   :  { %1129 = vmatprep.subr.bf16.mxu0 %v1313_v58 }
 0x188   :  { %1130 = vmatpush3.bf16.msra.mxu0 %v1223_v35 }
 0x189   :  { %1131 = vmatprep.subr.bf16.mxu0 %v1313_v58 }
 0x18c   :  { %1132 = vmatpush3.bf16.msra.mxu0 %v1224_v37 }
 0x18d   :  { %1133 = vmatprep.subr.bf16.mxu0 %v1313_v58  ;;  %v1057_v58 = vld [vmem:[%s1529_s8] ss:$0 sm:$0xff] }
 0x190   :  { %1134 = vmatpush3.bf16.msra.mxu0 %v1225_v38 }
 0x246   :  { %v1082_v41 = vpop.f32.mrb[0].mxu0  ;;  %v1104_v42 = vpop.f32.mrb[8].mxu1 }
 0x247   :  { %v1083_v44 = vpop.f32.mrb[1].mxu0  ;;  %v1105_v45 = vpop.f32.mrb[9].mxu1 }
 0x248   :  { %v1084_v46 = vadd.f32 %v1083_v44, %v1082_v41  ;;  %v1106_v47 = vadd.f32 %v1105_v45, %v1104_v42  ;;  %v1085_v48 = vpop.f32.mrb[2].mxu0  ;;  %v1107_v49 = vpop.f32.mrb[10].mxu1 }
 0x249   :  { %v1086_v50 = vpop.f32.mrb[3].mxu0  ;;  %v1108_v51 = vpop.f32.mrb[11].mxu1 }
 0x24a   :  { %v821_v52 = vadd.f32 %v1084_v46, %v1024_v43 }
 0x24c   :  { %v861_v53 = vadd.f32 %v1106_v47, %v821_v52 }
 0x24e   :  { %v866_v54 = vmul.f32 0.05, %v861_v53 }
 0x250   :  { %v867_v55 = vmax.f32 %v861_v53, %v866_v54 }
 0x252   :  { %v868_v56 = vpack.c.bf16 %v867_v55, %v867_v55 }
 0x254   :  { %1136 = vmatmul.mubr.bf16.vlgmr.msra.gmra.mrb[4].mxu0 %v868_v56 }
 0x327   :  { %v974_v57 = vpop.f32.mrb[4].mxu0 }
 0x328   :  { %v975_v59 = vadd.f32 %v1057_v58, %v974_v57  ;;  %v1137_v0 = vpop.f32.mrb[5].mxu0 }
 0x329   :  { %v977_v1 = vpop.f32.mrb[6].mxu0 }
 0x32a   :  { %v1138_v2 = vpop.f32.mrb[7].mxu0  ;;  %981 = vst.msk [vmem:[#allocation7] sm:$0xff] %vm980_vm2, %v975_v59 }
 0x32b   :  { %1289 = shalt.err (!%p1286_p6)
}
 0x32c   :  { %s1290_s8 = scalar_lea.hbm %s1530_s9, 128 }
 0x32d   :  { %p1291_p7 = scmp.ne.s32.totalorder %s1530_s9, %s1290_s8  ;;  %p1294_p8 = scmp.lt.u32.totalorder %s1290_s8, %s1530_s9 }
 0x32f   :  { %p1296_p9 = pnand %p1294_p8, %p1291_p7 }
 0x331   :  { %1299 = shalt.err (!%p1296_p9)
}
 0x332   :  { %991 = dma.vmem_to_hbm [thread:$0]  %s989_s6, 128, %s1530_s9, [#allocation4]  }
 0x333   :  { %1304 = dma.done.wait [#allocation4], 128  }
 0x334   :  { %1305 = vsyncadd [#allocation4], 4294967168 }
 0x335   :  { %995 = vsyncpa [#allocation3], 1 }
 0x336   :  { %996 = vsyncpa [#allocation6], 1 }
 0x337   :  { %997 = vsyncpa [#allocation4], 1 }

</bundles_post_ra>
